<compile_context>
chip_gen: v5e
topology: v5e:2x2
jax: 0.10.0
libtpu: 0.0.40
codegen_flags: <defaults>
</compile_context>

<pallas_src>
import math

import jax
import jax.numpy as jnp
from jax.experimental import pallas as pl
from jax.experimental.pallas import tpu as pltpu


def _vmem_limit_bytes(default=48 << 20):
    """Generation-aware scoped-VMEM limit: ~64 MiB on v5e/v6e (128 MiB phys),
    ~48 MiB on v7x (64 MiB phys).  Falls back to a universally-safe 48 MiB."""
    try:
        cap = int(pltpu.get_tpu_info().vmem_capacity_bytes)
        return int(min(64 << 20, (3 * cap) // 4))
    except Exception:
        return int(default)


# ----------------------------------------------------------------------------
# Path 3: standalone streaming residual add (only for already-materialized fx).
# ----------------------------------------------------------------------------
def _residual_add_kernel(fx_ref, x_ref, o_ref):
    # o = fn(x) + x   (elementwise, VPU)
    o_ref[...] = fx_ref[...] + x_ref[...]


def residual_add(fx: jax.Array, x: jax.Array) -> jax.Array:
    """Pallas residual add fx + x for arbitrary-rank inputs of equal shape.

    No padding/slicing copies: the flat stream is viewed as a lane-dense
    (rows, C) slab when T divides by 128 (free reshape), otherwise the original
    trailing dim is kept; a ragged last row-block is handled by Pallas's
    out-of-bounds write masking instead of HBM padding.
    """
    assert fx.shape == x.shape and fx.dtype == x.dtype
    orig_shape = x.shape
    dtype = x.dtype
    itemsize = jnp.dtype(dtype).itemsize
    T = math.prod(orig_shape) if orig_shape else 1

    # Lane-dense view: multiple of 128 dividing T exactly -> unmasked vst.
    C = None
    for cand in (1024, 512, 256, 128):
        if T % cand == 0:
            C = cand
            break
    if C is None:
        # Ragged total: keep the original trailing dim (no data movement).
        C = orig_shape[-1] if len(orig_shape) >= 1 and orig_shape[-1] > 0 else 1
    rows = T // C

    fx2 = fx.reshape(rows, C)
    x2 = x.reshape(rows, C)

    # dtype-aware sublane multiple: f32 -> 8, bf16 -> 16, int8/fp8 -> 32.
    sub = {1: 32, 2: 16}.get(itemsize, 8)

    # Row tile: ~4 MiB per block (amortizes ~0.35us/step, esp. on v7x HBM),
    # but never fewer than 2 grid blocks when the data allows it so the
    # 'parallel' grid actually splits across v7x's two TensorCores.
    if rows <= sub:
        tr = rows
    else:
        tr_target = max(sub, ((4 << 20) // (C * itemsize)) // sub * sub)
        half = pl.cdiv(rows, 2 * sub) * sub            # ~rows/2, sublane-rounded
        tr = max(sub, min(tr_target, half, (rows // sub) * sub))
    grid_len = pl.cdiv(rows, tr)                       # last block write-masked

    block_bytes = tr * C * itemsize
    vmem_limit = min(max(6 * block_bytes + (8 << 20), 32 << 20), _vmem_limit_bytes())

    out = pl.pallas_call(
        _residual_add_kernel,
        out_shape=jax.ShapeDtypeStruct((rows, C), dtype),
        grid_spec=pltpu.PrefetchScalarGridSpec(
            num_scalar_prefetch=0,
            grid=(grid_len,),
            in_specs=[
                pl.BlockSpec((tr, C), lambda i: (i, 0)),
                pl.BlockSpec((tr, C), lambda i: (i, 0)),
            ],
            out_specs=pl.BlockSpec((tr, C), lambda i: (i, 0)),
        ),
        compiler_params=pltpu.CompilerParams(
            dimension_semantics=("parallel",),
            vmem_limit_bytes=int(vmem_limit),
        ),
        cost_estimate=pl.CostEstimate(
            flops=T, transcendentals=0, bytes_accessed=3 * T * itemsize
        ),
    )(fx2, x2)
    return out.reshape(orig_shape)


# ----------------------------------------------------------------------------
# Path 1: residual add fused into fn's epilogue (linear fn demonstrator).
# K/N tiled with an f32 accumulator so it scales to real ViT widths.
# ----------------------------------------------------------------------------
def _fused_linear_residual_kernel(x_ref, w_ref, b_ref, r_ref, o_ref, acc_ref):
    k = pl.program_id(2)

    @pl.when(k == 0)
    def _init():
        acc_ref[...] = jnp.zeros_like(acc_ref)

    acc_ref[...] += jnp.dot(
        x_ref[...], w_ref[...], preferred_element_type=jnp.float32
    )

    @pl.when(k == pl.num_programs(2) - 1)
    def _finalize():
        # f32 epilogue (bias + residual) then cast -- correct on v5e too
        # (no bf16 VPU there), and exact for bf16 inputs.
        o_ref[...] = (
            acc_ref[...]
            + b_ref[...].astype(jnp.float32)
            + r_ref[...].astype(jnp.float32)
        ).astype(o_ref.dtype)


def fused_linear_residual(
    x: jax.Array, W: jax.Array, b: jax.Array, *, tm=256, tn=512, tk=512
) -> jax.Array:
    orig_shape = x.shape
    D = orig_shape[-1]
    E = W.shape[1]
    assert W.shape[0] == D and E == D  # residual needs fn(x) to match x's shape
    R = math.prod(orig_shape[:-1])
    dtype = x.dtype
    itemsize = jnp.dtype(dtype).itemsize

    x2 = x.reshape(R, D)
    b2 = b.reshape(1, E)

    # M tile: MXU-sized (256) when possible; ragged tail rows are write-masked
    # (no padding of R in HBM).
    if R < 8:
        tm_ = R
    else:
        tm_ = max(8, min(tm, (R // 8) * 8))
        # Ensure >= 2 M-blocks when the data allows it (v7x megacore split).
        if R > 16 and pl.cdiv(R, tm_) < 2:
            tm_ = max(8, pl.cdiv(R, 16) * 8)

    # N tile: multiple of 128 (unmasked lane stores) or the full output width.
    tn_ = min(tn, E) if E % 128 == 0 else E

    # K tile must tile D exactly (no garbage accumulation from masked reads).
    if D <= tk:
        tk_ = D
    else:
        tk_ = D
        for cand in (tk, 384, 256, 128):
            if D % cand == 0:
                tk_ = cand
                break

    grid = (pl.cdiv(R, tm_), pl.cdiv(E, tn_), pl.cdiv(D, tk_))

    block_bytes = (tm_ * tk_ + tk_ * tn_ + tn_ + 2 * tm_ * tn_) * itemsize
    vmem_limit = min(
        max(2 * block_bytes + tm_ * tn_ * 4 + (8 << 20), 32 << 20),
        _vmem_limit_bytes(),
    )

    out = pl.pallas_call(
        _fused_linear_residual_kernel,
        out_shape=jax.ShapeDtypeStruct((R, E), dtype),
        grid_spec=pltpu.PrefetchScalarGridSpec(
            num_scalar_prefetch=0,
            grid=grid,
            in_specs=[
                pl.BlockSpec((tm_, tk_), lambda i, j, k: (i, k)),   # x (matmul lhs)
                pl.BlockSpec((tk_, tn_), lambda i, j, k: (k, j)),   # W tile
                pl.BlockSpec((1, tn_), lambda i, j, k: (0, j)),     # bias tile
                pl.BlockSpec((tm_, tn_), lambda i, j, k: (i, j)),   # x (residual)
            ],
            out_specs=pl.BlockSpec((tm_, tn_), lambda i, j, k: (i, j)),
            scratch_shapes=[pltpu.VMEM((tm_, tn_), jnp.float32)],
        ),
        compiler_params=pltpu.CompilerParams(
            dimension_semantics=("parallel", "parallel", "arbitrary"),
            vmem_limit_bytes=int(vmem_limit),
        ),
        cost_estimate=pl.CostEstimate(
            flops=2 * R * D * E,
            transcendentals=0,
            bytes_accessed=(2 * R * D + D * E + E + R * E) * itemsize,
        ),
    )(x2, W, b2, x2)
    return out.reshape(orig_shape)


class PallasLinear:
    """Example wrapped sub-module that exposes a fused-residual epilogue
    (stand-in for a ViT attention/FFN out-projection with E == D)."""

    def __init__(self, W, b):
        self.W = W
        self.b = b

    def __call__(self, x, **kwargs):
        return jnp.einsum("...d,de->...e", x, self.W) + self.b

    def fused_residual(self, x, **kwargs):
        return fused_linear_residual(x, self.W, self.b)


class Residual:
    """JAX/Pallas equivalent of the PyTorch Residual module: fn(x) + x.

    - fn exposes `fused_residual`  -> add fused into fn's kernel epilogue.
    - ordinary XLA-traced fn       -> `fn(x) + x`, XLA fuses the add into
                                      fn's output fusion (no extra HBM pass).
    - fn(x) already materialized   -> standalone Pallas streaming-add kernel
      (signalled via force_pallas_add or fn.output_is_materialized).
    """
    # TODO(synk): arbitrary wrapped fn bodies cannot be lowered into a single
    # Pallas kernel generically; only fns exposing `fused_residual` fuse fully.

    def __init__(self, fn, *, force_pallas_add=False):
        self.fn = fn
        self.force_pallas_add = force_pallas_add

    def __call__(self, x, **kwargs):
        fused = getattr(self.fn, "fused_residual", None)
        if fused is not None:
            return fused(x, **kwargs)
        fx = self.fn(x, **kwargs)
        if self.force_pallas_add or getattr(self.fn, "output_is_materialized", False):
            return residual_add(fx, x)
        return fx + x


if __name__ == "__main__":
    # Small shapes consistent with a ViT token stream: batch=2, seq=8, hidden=32.
    B, N, D = 2, 8, 32
    key = jax.random.PRNGKey(0)
    kx, kw, kb, ka, kc = jax.random.split(key, 5)

    x = jax.random.normal(kx, (B, N, D), dtype=jnp.float32)
    W = jax.random.normal(kw, (D, D), dtype=jnp.float32) * 0.02
    b = jax.random.normal(kb, (D,), dtype=jnp.float32) * 0.02

    ref = jnp.einsum("bnd,de->bne", x, W) + b + x

    # Path 1: fused epilogue -> single Pallas kernel (matmul + bias + residual).
    out_fused = jax.block_until_ready(Residual(PallasLinear(W, b))(x))
    assert out_fused.shape == (B, N, D)
    assert jnp.allclose(out_fused, ref, atol=1e-5, rtol=1e-5)

    # Path 2: arbitrary XLA fn -> residual add left to XLA output fusion.
    def plain_fn(t, **kwargs):
        return jnp.einsum("bnd,de->bne", t, W) + b

    out_xla = jax.block_until_ready(Residual(plain_fn)(x))
    assert jnp.allclose(out_xla, ref, atol=1e-5, rtol=1e-5)

    # Path 3: fn(x) treated as already materialized -> Pallas streaming add.
    out_pallas = jax.block_until_ready(Residual(plain_fn, force_pallas_add=True)(x))
    assert jnp.allclose(out_pallas, ref, atol=1e-5, rtol=1e-5)

    # Ragged-shape check for the streaming add (masked last block, no padding).
    a = jax.random.normal(ka, (2, 7, 96), dtype=jnp.float32)
    c = jax.random.normal(kc, (2, 7, 96), dtype=jnp.float32)
    out_ragged = jax.block_until_ready(residual_add(a, c))
    assert jnp.allclose(out_ragged, a + c, atol=1e-6, rtol=1e-6)

    print("KERNEL_OK")
</pallas_src>

<mosaic_0001>
module attributes {stable_mosaic.version = 11 : i64} {
  func.func @_fused_linear_residual_kernel(%arg0: i32, %arg1: i32, %arg2: i32, %arg3: memref<16x32xf32, #tpu.memory_space<vmem>>, %arg4: memref<32x32xf32, #tpu.memory_space<vmem>>, %arg5: memref<1x32xf32, #tpu.memory_space<vmem>>, %arg6: memref<16x32xf32, #tpu.memory_space<vmem>>, %arg7: memref<16x32xf32, #tpu.memory_space<vmem>>, %arg8: memref<16x32xf32, #tpu.memory_space<vmem>>) attributes {dimension_semantics = [#tpu.dimension_semantics<parallel>, #tpu.dimension_semantics<parallel>, #tpu.dimension_semantics<arbitrary>], iteration_bounds = array<i64: 1, 1, 1>, scalar_prefetch = 0 : i64, scratch_operands = 1 : i64, tpu.core_type = #tpu.core_type<tc>, window_params = [{transform_indices = @transform_0, window_bounds = array<i64: 16, 32>}, {transform_indices = @transform_1, window_bounds = array<i64: 32, 32>}, {transform_indices = @transform_2, window_bounds = array<i64: 1, 32>}, {transform_indices = @transform_3, window_bounds = array<i64: 16, 32>}, {transform_indices = @transform_4, window_bounds = array<i64: 16, 32>}]} {
    %c0_i32 = arith.constant 0 : i32
    %0 = arith.cmpi eq, %arg2, %c0_i32 : i32
    %1 = arith.extui %0 : i1 to i32
    %c0_i32_0 = arith.constant 0 : i32
    %2 = arith.cmpi ne, %1, %c0_i32_0 : i32
    scf.if %2 {
      %cst_10 = arith.constant 0.000000e+00 : f32
      %12 = vector.broadcast %cst_10 : f32 to vector<16x32xf32>
      %c0_11 = arith.constant 0 : index
      %c0_12 = arith.constant 0 : index
      %13 = vector.load %arg8[%c0_11, %c0_12] : memref<16x32xf32, #tpu.memory_space<vmem>>, vector<16x32xf32>
      tpu.vector_store %arg8[%c0_11, %c0_12], %12 {strides = array<i32>} : memref<16x32xf32, #tpu.memory_space<vmem>>, vector<16x32xf32>,
    } else {
    }
    %c0 = arith.constant 0 : index
    %c0_1 = arith.constant 0 : index
    %3 = vector.load %arg8[%c0, %c0_1] : memref<16x32xf32, #tpu.memory_space<vmem>>, vector<16x32xf32>
    %c0_2 = arith.constant 0 : index
    %c0_3 = arith.constant 0 : index
    %4 = vector.load %arg3[%c0_2, %c0_3] : memref<16x32xf32, #tpu.memory_space<vmem>>, vector<16x32xf32>
    %c0_4 = arith.constant 0 : index
    %c0_5 = arith.constant 0 : index
    %5 = vector.load %arg4[%c0_4, %c0_5] : memref<32x32xf32, #tpu.memory_space<vmem>>, vector<32x32xf32>
    %cst = arith.constant dense<0.000000e+00> : vector<16x32xf32>
    %6 = tpu.matmul %4, %5, %cst {dimension_numbers = #tpu.dot_dimension_numbers<[1], [0], [0], [1], [0, 0, 1, 1], [], []>} : vector<16x32xf32>, vector<32x32xf32>, vector<16x32xf32> -> vector<16x32xf32>
    %7 = arith.addf %3, %6 : vector<16x32xf32>
    %c0_6 = arith.constant 0 : index
    %c0_7 = arith.constant 0 : index
    %8 = vector.load %arg8[%c0_6, %c0_7] : memref<16x32xf32, #tpu.memory_space<vmem>>, vector<16x32xf32>
    tpu.vector_store %arg8[%c0_6, %c0_7], %7 {strides = array<i32>} : memref<16x32xf32, #tpu.memory_space<vmem>>, vector<16x32xf32>,
    %c0_i32_8 = arith.constant 0 : i32
    %9 = arith.cmpi eq, %arg2, %c0_i32_8 : i32
    %10 = arith.extui %9 : i1 to i32
    %c0_i32_9 = arith.constant 0 : i32
    %11 = arith.cmpi ne, %10, %c0_i32_9 : i32
    scf.if %11 {
      %c0_10 = arith.constant 0 : index
      %c0_11 = arith.constant 0 : index
      %12 = vector.load %arg8[%c0_10, %c0_11] : memref<16x32xf32, #tpu.memory_space<vmem>>, vector<16x32xf32>
      %c0_12 = arith.constant 0 : index
      %c0_13 = arith.constant 0 : index
      %13 = vector.load %arg5[%c0_12, %c0_13] : memref<1x32xf32, #tpu.memory_space<vmem>>, vector<1x32xf32>
      %14 = vector.broadcast %13 : vector<1x32xf32> to vector<16x32xf32>
      %15 = arith.addf %12, %14 : vector<16x32xf32>
      %c0_14 = arith.constant 0 : index
      %c0_15 = arith.constant 0 : index
      %16 = vector.load %arg6[%c0_14, %c0_15] : memref<16x32xf32, #tpu.memory_space<vmem>>, vector<16x32xf32>
      %17 = arith.addf %15, %16 : vector<16x32xf32>
      %c0_16 = arith.constant 0 : index
      %c0_17 = arith.constant 0 : index
      %18 = vector.load %arg7[%c0_16, %c0_17] : memref<16x32xf32, #tpu.memory_space<vmem>>, vector<16x32xf32>
      tpu.vector_store %arg7[%c0_16, %c0_17], %17 {strides = array<i32>} : memref<16x32xf32, #tpu.memory_space<vmem>>, vector<16x32xf32>,
    } else {
    }
    return
  }
  func.func @transform_0(%arg0: i32, %arg1: i32, %arg2: i32) -> (i32, i32) {
    %c0_i32 = arith.constant 0 : i32
    return %arg0, %arg2 : i32, i32
  }
  func.func @transform_1(%arg0: i32, %arg1: i32, %arg2: i32) -> (i32, i32) {
    %c0_i32 = arith.constant 0 : i32
    return %arg2, %arg1 : i32, i32
  }
  func.func @transform_2(%arg0: i32, %arg1: i32, %arg2: i32) -> (i32, i32) {
    %c0_i32 = arith.constant 0 : i32
    %c0_i32_0 = arith.constant 0 : i32
    return %c0_i32, %arg1 : i32, i32
  }
  func.func @transform_3(%arg0: i32, %arg1: i32, %arg2: i32) -> (i32, i32) {
    %c0_i32 = arith.constant 0 : i32
    return %arg0, %arg1 : i32, i32
  }
  func.func @transform_4(%arg0: i32, %arg1: i32, %arg2: i32) -> (i32, i32) {
    %c0_i32 = arith.constant 0 : i32
    return %arg0, %arg1 : i32, i32
  }
}

</mosaic_0001>

<bundles_post_ra>
// kernel: tpu_custom_call.1
= control target key start
LH: loop header
LB: loop body
LE: loop exit
PB: predicated region body
PF: predicated region fallthrough
CT: control target
= control target key end

     0   :  { %9 = vsyncpa [#allocation4], 0  ;;  %s334_s0 = inlined_call_operand.hbm [shape: f32[16,32], index: 0, kind: input, shape index: {}]   ;;  %s335_s1 = inlined_call_operand.hbm [shape: f32[32,32], index: 1, kind: input, shape index: {}]   ;;  %s336_s2 = inlined_call_operand.vmem [shape: f32[1,32], index: 2, kind: input, shape index: {}]   ;;  %s337_s3 = inlined_call_operand.hbm [shape: f32[16,32], index: 3, kind: input, shape index: {}]   ;;  %s338_s4 = inlined_call_operand.hbm [shape: f32[16,32], index: 4, kind: output, shape index: {}]  }
   0x1   :  { %10 = vsyncpa [#allocation7], 0 }
   0x2   :  { %11 = vsyncpa [#allocation5], 0  ;;  %s29_s17 = sshll.u32 %s335_s1, 4  ;;  %s267_s18 = smov [#allocation6]   ;;  %s30_s17 = int_to_ptr.hbm [resolvable:$true] %s29_s17 }
   0x3   :  { %s31_s19 = sshll.u32 %s267_s18, 4  ;;  %s16_s22 = sshll.u32 %s334_s0, 4  ;;  %s32_s19 = int_to_ptr.vmem [resolvable:$true] %s31_s19  ;;  %s17_s22 = int_to_ptr.hbm [resolvable:$true] %s16_s22 }
   0x4   :  { %s268_s23 = smov 128   ;;  %s269_s24 = smov 8  }
   0x5   :  { %37 = dma.hbm_to_vmem [thread:$0]  %s30_s17, 512, %s32_s19, [#allocation7], %s268_s23, %s268_s23, %s269_s24  }
   0x6   :  { %s270_s25 = smov [#allocation3]   ;;  %s44_s1 = sshll.u32 %s337_s3, 4  ;;  %s45_s1 = int_to_ptr.hbm [resolvable:$true] %s44_s1 }
   0x7   :  { %s18_s26 = sshll.u32 %s270_s25, 4  ;;  %s271_s0 = smov [#allocation8]   ;;  %s19_s26 = int_to_ptr.vmem [resolvable:$true] %s18_s26 }
   0x8   :  { %24 = dma.hbm_to_vmem [thread:$0]  %s17_s22, 256, %s19_s26, [#allocation4], %s268_s23, %s268_s23, %s269_s24  }
   0x9   :  { %s46_s29 = sshll.u32 %s271_s0, 4  ;;  %s47_s29 = int_to_ptr.vmem [resolvable:$true] %s46_s29 }
   0xa   :  { %52 = dma.hbm_to_vmem [thread:$0]  %s45_s1, 256, %s47_s29, [#allocation7], %s268_s23, %s268_s23, %s269_s24  }
   0xb   :  { %261 = dma.done.wait [#allocation4], 256  }
   0xc   :  { %262 = vsyncadd [#allocation4], 4294967040 }
   0xd   :  { %263 = dma.done.wait [#allocation7], 768  }
   0xe   :  { %264 = vsyncadd [#allocation7], 4294966528  ;;  %vm69_vm0 = vcmask 261120   ;;  %v272_v0 = vmov 0.0   ;;  %v79_v1 = vld [vmem:[#allocation6 + $0x18] sm:$0xff]  ;;  %v78_v2 = vld [vmem:[#allocation6 + $0x10] sm:$0xff] }
   0xf   :  { %70 = vst.msk [vmem:[#allocation2] sm:$0xff] %vm69_vm0, %v272_v0  ;;  %99 = vmatpush.msra.mxu0 %v79_v1  ;;  %153 = vmatpush.msra.mxu1 %v79_v1  ;;  %v77_v3 = vld [vmem:[#allocation6 + $0x8] sm:$0xff]  ;;  %v76_v4 = vld [vmem:[#allocation6] sm:$0xff]  ;;  %v74_v5 = vld [vmem:[#allocation3] sm:$0xff]  ;;  %s273_s5 = smov [#allocation9]   ;;  %s137_s9 = sshll.u32 %s338_s4, 4  ;;  %s138_s9 = int_to_ptr.hbm [resolvable:$true] %s137_s9 }
  0x10   :  { %71 = vst.msk [vmem:[#allocation2 + $0x8] sm:$0xff] %vm69_vm0, %v272_v0  ;;  %v75_v6 = vld [vmem:[#allocation3 + $0x8] sm:$0xff]  ;;  %v164_v13 = vld [vmem:[%s336_s2] ss:$0 sm:$0xff]  ;;  %v126_v18 = vld [vmem:[#allocation8 + $0x8] sm:$0xff]  ;;  %s135_s6 = sshll.u32 %s273_s5, 4  ;;  %s136_s6 = int_to_ptr.vmem [resolvable:$true] %s135_s6 }
  0x11   :  { %100 = vmatpush.msra.mxu0 %v78_v2  ;;  %154 = vmatpush.msra.mxu1 %v78_v2  ;;  %v125_v15 = vld [vmem:[#allocation8] sm:$0xff] }
  0x13   :  { %101 = vmatpush.msra.mxu0 %v77_v3  ;;  %155 = vmatpush.msra.mxu1 %v77_v3 }
  0x15   :  { %102 = vmatpush.msra.mxu0 %v76_v4  ;;  %156 = vmatpush.msra.mxu1 %v76_v4 }
  0x16   :  { %151 = vmatmul.msk.f32.vlgmr.msra.gmra.mxu0 %vm69_vm0, %v74_v5  ;;  %152 = vmatmul.msk.f32.vlgmr.msra.gmra.mxu1 %vm69_vm0, %v75_v6  ;;  %v72_v7 = vld [vmem:[#allocation2] sm:$0xff] }
  0x17   :  { %v73_v8 = vld [vmem:[#allocation2 + $0x8] sm:$0xff] }
  0x93   :  { %v104_v9 = vpop.f32.mrf.mxu0  ;;  %v107_v10 = vpop.f32.mrf.mxu1 }
  0x94   :  { %v110_v11 = vadd.f32 %v104_v9, %v72_v7  ;;  %v111_v12 = vadd.f32 %v107_v10, %v73_v8 }
  0x96   :  { %112 = vst.msk [vmem:[#allocation2] sm:$0xff] %vm69_vm0, %v110_v11 }
  0x97   :  { %113 = vst.msk [vmem:[#allocation2 + $0x8] sm:$0xff] %vm69_vm0, %v111_v12 }
  0x9d   :  { %v117_v14 = vld [vmem:[#allocation2] sm:$0xff] }
  0x9e   :  { %v118_v16 = vld [vmem:[#allocation2 + $0x8] sm:$0xff]  ;;  %v123_v17 = vadd.f32 %v164_v13, %v117_v14 }
  0x9f   :  { %v124_v19 = vadd.f32 %v164_v13, %v118_v16 }
  0xa0   :  { %v127_v20 = vadd.f32 %v125_v15, %v123_v17 }
  0xa1   :  { %v128_v21 = vadd.f32 %v126_v18, %v124_v19 }
  0xa2   :  { %129 = vst.msk [vmem:[#allocation9] sm:$0xff] %vm69_vm0, %v127_v20 }
  0xa3   :  { %130 = vst.msk [vmem:[#allocation9 + $0x8] sm:$0xff] %vm69_vm0, %v128_v21 }
  0xa4   :  { %143 = dma.vmem_to_hbm [thread:$0]  %s136_s6, 256, %s138_s9, [#allocation5], %s268_s23, %s268_s23, %s269_s24  }
  0xa5   :  { %265 = dma.done.wait [#allocation5], 256  }
  0xa6   :  { %266 = vsyncadd [#allocation5], 4294967040 }
  0xa7   :  { %148 = vsyncpa [#allocation4], 1 }
  0xa8   :  { %149 = vsyncpa [#allocation7], 1 }
  0xa9   :  { %150 = vsyncpa [#allocation5], 1 }

</bundles_post_ra>
